<compile_context>
chip_gen: v6e
topology: v6e:2x2x1
jax: 0.10.0
libtpu: 0.0.40
codegen_flags: <defaults>
</compile_context>

<pallas_src>
import functools

import jax
import jax.numpy as jnp
from jax import lax
from jax.experimental import pallas as pl
from jax.experimental.pallas import tpu as pltpu


def _recip(d):
    """Full-precision reciprocal: EUP approx vrcp + one Newton step on the VPU."""
    r = pl.reciprocal(d, approx=True)
    return r * (2.0 - d * r)


# ----------------------------------------------------------------------------
# Single-pass kernel: one batch element's (C, T) slab is resident in VMEM, so
# x is read from HBM exactly once; raw stats and the attention branch run over
# the same resident tile.
# ----------------------------------------------------------------------------
def _asp_single_kernel(x_ref, w1x_ref, w1ms_ref, aux_ref, w2_ref, b2_ref,
                       out_ref, *, eps):
    x_raw = x_ref[...]                                   # (C, T) streaming dtype
    x = x_raw.astype(jnp.float32)
    C = x.shape[0]

    # raw (unnormalized) statistics over time — exact f32 adds
    s = jnp.sum(x, axis=1, keepdims=True)                # (C, 1) sum(x)
    s2 = jnp.sum(x * x, axis=1, keepdims=True)           # (C, 1) sum(x^2)
    std = jnp.sqrt(jnp.maximum(s2 - s * s, eps))
    ms = jnp.concatenate([s, std], axis=0)               # (2C, 1)

    aux = aux_ref[...]                                   # (H, 3): b1|scale|shift
    # means/stds are constant over T -> their conv1 contribution + b1 folds
    # into one per-output-channel constant.
    const = jnp.dot(w1ms_ref[...], ms,
                    preferred_element_type=jnp.float32) + aux[:, 0:1]

    # conv1 (1x1) -> ReLU -> BatchNorm1d(eval, folded) -> Tanh
    h = jnp.dot(w1x_ref[...], x_raw.astype(w1x_ref.dtype),
                preferred_element_type=jnp.float32) + const
    h = jnp.maximum(h, 0.0) * aux[:, 1:2] + aux[:, 2:3]
    h = jnp.tanh(h)

    # conv2 (1x1) + channel softmax (nn.Softmax(dim=-2))
    a = jnp.dot(w2_ref[...], h.astype(w2_ref.dtype),
                preferred_element_type=jnp.float32) + b2_ref[...]   # (C, T)
    a = a - jnp.max(a, axis=0, keepdims=True)
    a = jnp.exp(a)
    a = a * _recip(jnp.sum(a, axis=0, keepdims=True))

    # time softmax (F.softmax(dim=2)): a in (0, 1] so no max shift is needed.
    e = jnp.exp(a)
    ex = e * x
    zsum = jnp.sum(e, axis=1, keepdims=True)
    exs = jnp.sum(ex, axis=1, keepdims=True)
    ex2s = jnp.sum(ex * x, axis=1, keepdims=True)

    r = _recip(zsum)
    m2 = exs * r
    std2 = jnp.sqrt(jnp.maximum(ex2s * r - m2 * m2, eps))
    # lane-dense store: (2C, 1) column -> (1, 2C) row
    row = jnp.transpose(jnp.concatenate([m2, std2], axis=0))
    out_ref[...] = row.reshape(1, 1, 2 * C)


# ----------------------------------------------------------------------------
# Two-phase time-tiled fallback (x does not fit VMEM).
#   phase 0: accumulate per-lane partial sum(x), sum(x^2).
#   phase 1: fold conv contribution of (constant-over-T) mean/std + b1, run
#            conv1->relu->bn->tanh->conv2->channel softmax, accumulate the
#            time-softmax numerators per-lane; normalize once at the end.
# ----------------------------------------------------------------------------
def _asp_tiled_kernel(x_ref, w1x_ref, w1ms_ref, aux_ref, w2_ref, b2_ref,
                      out_ref,
                      s_part, s2_part, const_acc, e_part, ex_part, ex2_part,
                      *, eps, t_valid, tile_t, needs_mask):
    p = pl.program_id(1)          # 0: raw-sum pass, 1: attention pass
    t = pl.program_id(2)          # time-tile index
    nt = pl.num_programs(2)
    nchunk = tile_t // 128        # tile_t is always a multiple of 128 here

    x_raw = x_ref[...]                                   # (C, tile_t)
    x = x_raw.astype(jnp.float32)
    C = x.shape[0]

    # ------------- phase 0: per-lane partial sum / sum-of-squares ------------
    @pl.when(p == 0)
    def _phase0():
        @pl.when(t == 0)
        def _init0():
            s_part[...] = jnp.zeros_like(s_part)
            s2_part[...] = jnp.zeros_like(s2_part)

        # padded time columns are zero -> they do not perturb these sums.
        # pure VALU adds on (C, 128) partials; no per-tile XLU reduction.
        s_new = s_part[...]
        s2_new = s2_part[...]
        for j in range(nchunk):
            xc = x[:, j * 128:(j + 1) * 128]
            s_new = s_new + xc
            s2_new = s2_new + xc * xc
        s_part[...] = s_new
        s2_part[...] = s2_new

    # ------------- phase 1: attention branch + weighted statistics -----------
    @pl.when(p == 1)
    def _phase1():
        aux = aux_ref[...]                               # (H, 3): b1|scale|shift

        @pl.when(t == 0)
        def _init1():
            s = jnp.sum(s_part[...], axis=1, keepdims=True)       # (C, 1)
            s2 = jnp.sum(s2_part[...], axis=1, keepdims=True)
            std = jnp.sqrt(jnp.maximum(s2 - s * s, eps))
            ms = jnp.concatenate([s, std], axis=0)                 # (2C, 1)
            const_acc[...] = (jnp.dot(w1ms_ref[...], ms,
                                      preferred_element_type=jnp.float32)
                              + aux[:, 0:1])
            e_part[...] = jnp.zeros_like(e_part)
            ex_part[...] = jnp.zeros_like(ex_part)
            ex2_part[...] = jnp.zeros_like(ex2_part)

        # conv1 (1x1) -> ReLU -> BatchNorm1d(eval, folded) -> Tanh
        h = jnp.dot(w1x_ref[...], x_raw.astype(w1x_ref.dtype),
                    preferred_element_type=jnp.float32) + const_acc[...]
        h = jnp.maximum(h, 0.0) * aux[:, 1:2] + aux[:, 2:3]
        h = jnp.tanh(h)

        # conv2 (1x1) + channel softmax (nn.Softmax(dim=-2))
        a = jnp.dot(w2_ref[...], h.astype(w2_ref.dtype),
                    preferred_element_type=jnp.float32) + b2_ref[...]
        a = a - jnp.max(a, axis=0, keepdims=True)
        a = jnp.exp(a)
        a = a * _recip(jnp.sum(a, axis=0, keepdims=True))

        # time-softmax numerator; a in (0, 1] so exp cannot overflow.
        e_full = jnp.exp(a)

        def _accumulate(e):
            ex = e * x
            ex2 = ex * x
            e_new = e_part[...]
            ex_new = ex_part[...]
            ex2_new = ex2_part[...]
            for j in range(nchunk):
                sl = slice(j * 128, (j + 1) * 128)
                e_new = e_new + e[:, sl]
                ex_new = ex_new + ex[:, sl]
                ex2_new = ex2_new + ex2[:, sl]
            e_part[...] = e_new
            ex_part[...] = ex_new
            ex2_part[...] = ex2_new

        if needs_mask:
            # mask only on the final (partially valid) tile
            @pl.when(t < nt - 1)
            def _acc_unmasked():
                _accumulate(e_full)

            @pl.when(t == nt - 1)
            def _acc_masked():
                col = t * tile_t + lax.broadcasted_iota(jnp.int32, (1, tile_t), 1)
                _accumulate(jnp.where(col < t_valid, e_full, 0.0))
        else:
            _accumulate(e_full)

        @pl.when(t == nt - 1)
        def _finalize():
            zsum = jnp.sum(e_part[...], axis=1, keepdims=True)
            exs = jnp.sum(ex_part[...], axis=1, keepdims=True)
            ex2s = jnp.sum(ex2_part[...], axis=1, keepdims=True)
            r = _recip(zsum)
            m2 = exs * r
            std2 = jnp.sqrt(jnp.maximum(ex2s * r - m2 * m2, eps))
            row = jnp.transpose(jnp.concatenate([m2, std2], axis=0))
            out_ref[...] = row.reshape(1, 1, 2 * C)


# ----------------------------------------------------------------------------
# Wrapper: parameter folding, path selection, generation-aware VMEM sizing.
# ----------------------------------------------------------------------------
def attentive_stats_pooling(x, params, eps=1e-6, bn_eps=1e-3,
                            matmul_dtype=jnp.bfloat16, stream_dtype=None,
                            max_time_tile=None):
    B, C, T = x.shape
    H = params["w1"].shape[0]

    if stream_dtype is not None:
        x = x.astype(stream_dtype)        # e.g. bf16: halves HBM bytes for x
    x_itemsize = jnp.dtype(x.dtype).itemsize

    # ---- fold & repack parameters outside the kernel -------------------------
    w1 = params["w1"]
    w1x = w1[:, :C].astype(matmul_dtype)             # mixes x          (H, C)
    w1ms = w1[:, C:].astype(jnp.float32)              # mixes [sum; std] (H, 2C)
    w2 = params["w2"].astype(matmul_dtype)             # (C, H)
    bn_scale = params["bn_gamma"] / jnp.sqrt(params["bn_rv"] + bn_eps)
    bn_shift = params["bn_beta"] - params["bn_rm"] * bn_scale
    aux = jnp.stack([params["b1"], bn_scale, bn_shift], axis=1).astype(jnp.float32)
    b2 = params["b2"].reshape(C, 1).astype(jnp.float32)

    # ---- per-generation VMEM capacity (v5e/v6e: 128 MiB, v7x: 64 MiB) --------
    try:
        vmem_cap = int(getattr(pltpu.get_tpu_info(), "vmem_capacity_bytes",
                               64 << 20))
    except Exception:
        vmem_cap = 64 << 20

    w_bytes = ((w1x.size + w2.size) * jnp.dtype(matmul_dtype).itemsize
               + (w1ms.size + aux.size + b2.size) * 4)
    headroom = 8 << 20

    def _est(tt):
        # double-buffered x block + live f32 intermediates (x32/h/a/e/ex) + weights
        return 2 * C * tt * x_itemsize + (4 * C + H) * tt * 4 + w_bytes + headroom

    if max_time_tile is None:
        single_pass = _est(T) <= vmem_cap
    else:
        single_pass = (T <= int(max_time_tile)) and (_est(T) <= vmem_cap)

    out_shape = jax.ShapeDtypeStruct((B, 1, 2 * C), jnp.float32)

    if single_pass:
        # ---- single-pass path: x read from HBM exactly once ------------------
        vmem_limit = int(min(max(_est(T), 32 << 20), vmem_cap))
        out = pl.pallas_call(
            functools.partial(_asp_single_kernel, eps=eps),
            out_shape=out_shape,
            grid_spec=pltpu.PrefetchScalarGridSpec(
                num_scalar_prefetch=0,
                grid=(B,),
                in_specs=[
                    pl.BlockSpec((pl.Squeezed(), C, T), lambda b: (b, 0, 0)),   # x
                    pl.BlockSpec((H, C), lambda b: (0, 0)),                      # w1x
                    pl.BlockSpec((H, 2 * C), lambda b: (0, 0)),                  # w1_ms
                    pl.BlockSpec((H, 3), lambda b: (0, 0)),                      # b1|bn
                    pl.BlockSpec((C, H), lambda b: (0, 0)),                      # w2
                    pl.BlockSpec((C, 1), lambda b: (0, 0)),                      # b2
                ],
                out_specs=pl.BlockSpec((1, 1, 2 * C), lambda b: (b, 0, 0)),
            ),
            compiler_params=pltpu.CompilerParams(
                dimension_semantics=("parallel",),
                vmem_limit_bytes=vmem_limit,
            ),
        )(x, w1x, w1ms, aux, w2, b2)
        return out.reshape(B, 2 * C, 1)                  # free row-major reshape

    # ---- tiled two-phase fallback --------------------------------------------
    tile_cap = 1024 if vmem_cap >= (96 << 20) else 512   # v5e/v6e vs v7x
    if max_time_tile is not None:
        tile_cap = min(tile_cap, max(128, (int(max_time_tile) // 128) * 128))
    tile_t = tile_cap
    while tile_t > 128 and _est(tile_t) > vmem_cap:
        tile_t -= 128
    t_pad = ((T + tile_t - 1) // tile_t) * tile_t
    nt = t_pad // tile_t
    needs_mask = (t_pad != T)
    if needs_mask:
        x = jnp.pad(x, ((0, 0), (0, 0), (0, t_pad - T)))

    vmem_limit = int(min(max(_est(tile_t), 32 << 20), vmem_cap))
    kernel = functools.partial(_asp_tiled_kernel, eps=eps, t_valid=T,
                               tile_t=tile_t, needs_mask=needs_mask)
    out = pl.pallas_call(
        kernel,
        out_shape=out_shape,
        grid_spec=pltpu.PrefetchScalarGridSpec(
            num_scalar_prefetch=0,
            grid=(B, 2, nt),                              # batch, phase, time tile
            in_specs=[
                pl.BlockSpec((pl.Squeezed(), C, tile_t), lambda b, p, t: (b, 0, t)),
                pl.BlockSpec((H, C), lambda b, p, t: (0, 0)),                     # w1x
                pl.BlockSpec((H, 2 * C), lambda b, p, t: (0, 0)),                 # w1_ms
                pl.BlockSpec((H, 3), lambda b, p, t: (0, 0)),                     # b1|bn
                pl.BlockSpec((C, H), lambda b, p, t: (0, 0)),                     # w2
                pl.BlockSpec((C, 1), lambda b, p, t: (0, 0)),                     # b2
            ],
            out_specs=pl.BlockSpec((1, 1, 2 * C), lambda b, p, t: (b, 0, 0)),
            scratch_shapes=[
                pltpu.VMEM((C, 128), jnp.float32),        # s_part   (per-lane)
                pltpu.VMEM((C, 128), jnp.float32),        # s2_part
                pltpu.VMEM((H, 1), jnp.float32),          # const_acc
                pltpu.VMEM((C, 128), jnp.float32),        # e_part
                pltpu.VMEM((C, 128), jnp.float32),        # ex_part
                pltpu.VMEM((C, 128), jnp.float32),        # ex2_part
            ],
        ),
        compiler_params=pltpu.CompilerParams(
            dimension_semantics=("parallel", "arbitrary", "arbitrary"),
            vmem_limit_bytes=vmem_limit,
        ),
    )(x, w1x, w1ms, aux, w2, b2)
    return out.reshape(B, 2 * C, 1)


def reference_jax(x, params, eps=1e-6, bn_eps=1e-3):
    """Plain-JAX mirror of the PyTorch forward (eval-mode BatchNorm)."""
    s = jnp.sum(x, axis=2)
    std = jnp.sqrt(jnp.maximum(jnp.sum(x ** 2, axis=2) - s ** 2, eps))
    T = x.shape[2]
    attn_in = jnp.concatenate(
        [x, jnp.repeat(s[:, :, None], T, 2), jnp.repeat(std[:, :, None], T, 2)],
        axis=1)
    h = jnp.einsum("oc,bct->bot", params["w1"], attn_in) + params["b1"][None, :, None]
    h = jnp.maximum(h, 0.0)
    h = ((h - params["bn_rm"][None, :, None]) /
         jnp.sqrt(params["bn_rv"][None, :, None] + bn_eps)
         * params["bn_gamma"][None, :, None] + params["bn_beta"][None, :, None])
    h = jnp.tanh(h)
    a = jnp.einsum("oh,bht->bot", params["w2"], h) + params["b2"][None, :, None]
    a = jax.nn.softmax(a, axis=1)   # nn.Softmax(dim=-2)
    a = jax.nn.softmax(a, axis=2)   # F.softmax(dim=2)
    m2 = jnp.sum(a * x, axis=2)
    std2 = jnp.sqrt(jnp.maximum(jnp.sum(a * x ** 2, axis=2) - m2 ** 2, eps))
    return jnp.concatenate([m2, std2], axis=1)[:, :, None]


def _make_params(key, C, H):
    k = jax.random.split(key, 8)
    return {
        "w1": 0.3 * jax.random.normal(k[0], (H, 3 * C), jnp.float32),
        "b1": 0.1 * jax.random.normal(k[1], (H,), jnp.float32),
        "bn_gamma": 1.0 + 0.1 * jax.random.normal(k[2], (H,), jnp.float32),
        "bn_beta": 0.1 * jax.random.normal(k[3], (H,), jnp.float32),
        "bn_rm": 0.05 * jax.random.normal(k[4], (H,), jnp.float32),
        "bn_rv": 1.0 + 0.1 * jnp.abs(jax.random.normal(k[5], (H,), jnp.float32)),
        "w2": 0.3 * jax.random.normal(k[6], (C, H), jnp.float32),
        "b2": 0.05 * jax.random.normal(k[7], (C,), jnp.float32),
    }


if __name__ == "__main__":
    key = jax.random.PRNGKey(0)
    kx1, kp1, kx2, kp2 = jax.random.split(key, 4)

    # ---- case 1: small shapes -> single-pass resident-x path -----------------
    B, C, T, H = 2, 8, 16, 16
    x1 = jax.random.normal(kx1, (B, C, T), jnp.float32)
    p1 = _make_params(kp1, C, H)
    ref1 = reference_jax(x1, p1)

    out1 = jax.block_until_ready(
        attentive_stats_pooling(x1, p1, matmul_dtype=jnp.float32))
    assert out1.shape == (B, 2 * C, 1), out1.shape
    assert jnp.allclose(out1, ref1, atol=5e-4, rtol=5e-4), \
        float(jnp.max(jnp.abs(out1 - ref1)))

    out1b = jax.block_until_ready(attentive_stats_pooling(x1, p1))  # default bf16 matmuls
    assert jnp.allclose(out1b, ref1, atol=5e-2, rtol=5e-2), \
        float(jnp.max(jnp.abs(out1b - ref1)))

    # ---- case 2: tiled masked path (T=160, tile=128, padded to 256) ----------
    B, C, T, H = 2, 8, 160, 16
    x2 = jax.random.normal(kx2, (B, C, T), jnp.float32)
    p2 = _make_params(kp2, C, H)
    ref2 = reference_jax(x2, p2)

    out2 = jax.block_until_ready(
        attentive_stats_pooling(x2, p2, matmul_dtype=jnp.float32,
                                max_time_tile=128))
    assert out2.shape == (B, 2 * C, 1), out2.shape
    assert jnp.allclose(out2, ref2, atol=5e-4, rtol=5e-4), \
        float(jnp.max(jnp.abs(out2 - ref2)))

    # ---- case 2b: tiled path, no padding (T=256 = 2 full tiles) --------------
    x3 = jax.random.normal(jax.random.fold_in(kx2, 1), (B, C, 256), jnp.float32)
    ref3 = reference_jax(x3, p2)
    out3 = jax.block_until_ready(
        attentive_stats_pooling(x3, p2, matmul_dtype=jnp.float32,
                                max_time_tile=128))
    assert jnp.allclose(out3, ref3, atol=5e-4, rtol=5e-4), \
        float(jnp.max(jnp.abs(out3 - ref3)))

    # ---- case 3: bf16 matmuls + bf16-streamed x (halved HBM traffic) ---------
    # Compare against the reference evaluated on the bf16-rounded activations,
    # so the check isolates kernel-vs-reference differences (not input rounding).
    ref4 = reference_jax(x2.astype(jnp.bfloat16).astype(jnp.float32), p2)
    out4 = jax.block_until_ready(
        attentive_stats_pooling(x2, p2, max_time_tile=128,
                                stream_dtype=jnp.bfloat16))
    assert jnp.allclose(out4, ref4, atol=5e-2, rtol=5e-2), \
        float(jnp.max(jnp.abs(out4 - ref4)))

    print("KERNEL_OK")
</pallas_src>

<mosaic_0001>
module attributes {stable_mosaic.version = 11 : i64} {
  func.func @_asp_single_kernel(%arg0: i32, %arg1: memref<1x8x16xf32, #tpu.memory_space<vmem>>, %arg2: memref<16x8xf32, #tpu.memory_space<vmem>>, %arg3: memref<16x16xf32, #tpu.memory_space<vmem>>, %arg4: memref<16x3xf32, #tpu.memory_space<vmem>>, %arg5: memref<8x16xf32, #tpu.memory_space<vmem>>, %arg6: memref<8x1xf32, #tpu.memory_space<vmem>>, %arg7: memref<1x1x16xf32, #tpu.memory_space<vmem>>) attributes {dimension_semantics = [#tpu.dimension_semantics<parallel>], iteration_bounds = array<i64: 2>, scalar_prefetch = 0 : i64, scratch_operands = 0 : i64, tpu.core_type = #tpu.core_type<tc>, window_params = [{transform_indices = @transform_0, window_bounds = array<i64: 1, 8, 16>}, {pipeline_mode = #tpu.pipeline_mode<synchronous>, transform_indices = @transform_1, window_bounds = array<i64: 16, 8>}, {pipeline_mode = #tpu.pipeline_mode<synchronous>, transform_indices = @transform_2, window_bounds = array<i64: 16, 16>}, {pipeline_mode = #tpu.pipeline_mode<synchronous>, transform_indices = @transform_3, window_bounds = array<i64: 16, 3>}, {pipeline_mode = #tpu.pipeline_mode<synchronous>, transform_indices = @transform_4, window_bounds = array<i64: 8, 16>}, {pipeline_mode = #tpu.pipeline_mode<synchronous>, transform_indices = @transform_5, window_bounds = array<i64: 8, 1>}, {transform_indices = @transform_6, window_bounds = array<i64: 1, 1, 16>}]} {
    %c0 = arith.constant 0 : index
    %c0_0 = arith.constant 0 : index
    %c0_1 = arith.constant 0 : index
    %0 = vector.load %arg1[%c0, %c0_0, %c0_1] : memref<1x8x16xf32, #tpu.memory_space<vmem>>, vector<1x8x16xf32>
    %1 = vector.shape_cast %0 : vector<1x8x16xf32> to vector<8x16xf32>
    %cst = arith.constant dense<0.000000e+00> : vector<8xf32>
    %2 = vector.multi_reduction <add>, %1, %cst [1] : vector<8x16xf32> to vector<8xf32>
    %3 = vector.shape_cast %2 : vector<8xf32> to vector<8x1xf32>
    %4 = arith.mulf %1, %1 : vector<8x16xf32>
    %cst_2 = arith.constant dense<0.000000e+00> : vector<8xf32>
    %5 = vector.multi_reduction <add>, %4, %cst_2 [1] : vector<8x16xf32> to vector<8xf32>
    %6 = vector.shape_cast %5 : vector<8xf32> to vector<8x1xf32>
    %7 = arith.mulf %3, %3 : vector<8x1xf32>
    %8 = arith.subf %6, %7 : vector<8x1xf32>
    %cst_3 = arith.constant 9.99999997E-7 : f32
    %9 = vector.broadcast %cst_3 : f32 to vector<8x1xf32>
    %10 = arith.maximumf %8, %9 : vector<8x1xf32>
    %11 = math.sqrt %10 : vector<8x1xf32>
    %12 = tpu.concatenate %3, %11 in 0 : vector<8x1xf32>, vector<8x1xf32> -> vector<16x1xf32>
    %c0_4 = arith.constant 0 : index
    %c0_5 = arith.constant 0 : index
    %13 = vector.load %arg4[%c0_4, %c0_5] : memref<16x3xf32, #tpu.memory_space<vmem>>, vector<16x3xf32>
    %c0_6 = arith.constant 0 : index
    %c0_7 = arith.constant 0 : index
    %14 = vector.load %arg3[%c0_6, %c0_7] : memref<16x16xf32, #tpu.memory_space<vmem>>, vector<16x16xf32>
    %cst_8 = arith.constant dense<0.000000e+00> : vector<16x1xf32>
    %15 = tpu.matmul %14, %12, %cst_8 {dimension_numbers = #tpu.dot_dimension_numbers<[1], [0], [0], [1], [0, 0, 1, 1], [], []>} : vector<16x16xf32>, vector<16x1xf32>, vector<16x1xf32> -> vector<16x1xf32>
    %16 = vector.extract_strided_slice %13 {offsets = [0, 0], sizes = [16, 1], strides = [1, 1]} : vector<16x3xf32> to vector<16x1xf32>
    %17 = arith.addf %15, %16 : vector<16x1xf32>
    %c0_9 = arith.constant 0 : index
    %c0_10 = arith.constant 0 : index
    %18 = vector.load %arg2[%c0_9, %c0_10] : memref<16x8xf32, #tpu.memory_space<vmem>>, vector<16x8xf32>
    %cst_11 = arith.constant dense<0.000000e+00> : vector<16x16xf32>
    %19 = tpu.matmul %18, %1, %cst_11 {dimension_numbers = #tpu.dot_dimension_numbers<[1], [0], [0], [1], [0, 0, 1, 1], [], []>} : vector<16x8xf32>, vector<8x16xf32>, vector<16x16xf32> -> vector<16x16xf32>
    %20 = vector.broadcast %17 : vector<16x1xf32> to vector<16x16xf32>
    %21 = arith.addf %19, %20 : vector<16x16xf32>
    %cst_12 = arith.constant 0.000000e+00 : f32
    %22 = vector.broadcast %cst_12 : f32 to vector<16x16xf32>
    %23 = arith.maximumf %21, %22 : vector<16x16xf32>
    %24 = vector.extract_strided_slice %13 {offsets = [0, 1], sizes = [16, 1], strides = [1, 1]} : vector<16x3xf32> to vector<16x1xf32>
    %25 = vector.broadcast %24 : vector<16x1xf32> to vector<16x16xf32>
    %26 = arith.mulf %23, %25 : vector<16x16xf32>
    %27 = vector.extract_strided_slice %13 {offsets = [0, 2], sizes = [16, 1], strides = [1, 1]} : vector<16x3xf32> to vector<16x1xf32>
    %28 = vector.broadcast %27 : vector<16x1xf32> to vector<16x16xf32>
    %29 = arith.addf %26, %28 : vector<16x16xf32>
    %30 = math.tanh %29 : vector<16x16xf32>
    %c0_13 = arith.constant 0 : index
    %c0_14 = arith.constant 0 : index
    %31 = vector.load %arg5[%c0_13, %c0_14] : memref<8x16xf32, #tpu.memory_space<vmem>>, vector<8x16xf32>
    %cst_15 = arith.constant dense<0.000000e+00> : vector<8x16xf32>
    %32 = tpu.matmul %31, %30, %cst_15 {dimension_numbers = #tpu.dot_dimension_numbers<[1], [0], [0], [1], [0, 0, 1, 1], [], []>} : vector<8x16xf32>, vector<16x16xf32>, vector<8x16xf32> -> vector<8x16xf32>
    %c0_16 = arith.constant 0 : index
    %c0_17 = arith.constant 0 : index
    %33 = vector.load %arg6[%c0_16, %c0_17] : memref<8x1xf32, #tpu.memory_space<vmem>>, vector<8x1xf32>
    %34 = vector.broadcast %33 : vector<8x1xf32> to vector<8x16xf32>
    %35 = arith.addf %32, %34 : vector<8x16xf32>
    %cst_18 = arith.constant dense<0xFF800000> : vector<16xf32>
    %36 = vector.multi_reduction <maximumf>, %35, %cst_18 [0] : vector<8x16xf32> to vector<16xf32>
    %37 = vector.shape_cast %36 : vector<16xf32> to vector<1x16xf32>
    %38 = vector.broadcast %37 : vector<1x16xf32> to vector<8x16xf32>
    %39 = arith.subf %35, %38 : vector<8x16xf32>
    %40 = math.exp %39 : vector<8x16xf32>
    %cst_19 = arith.constant dense<0.000000e+00> : vector<16xf32>
    %41 = vector.multi_reduction <add>, %40, %cst_19 [0] : vector<8x16xf32> to vector<16xf32>
    %42 = vector.shape_cast %41 : vector<16xf32> to vector<1x16xf32>
    %43 = tpu.reciprocal %42 {approx = true} : vector<1x16xf32> -> vector<1x16xf32>
    %44 = arith.mulf %42, %43 : vector<1x16xf32>
    %cst_20 = arith.constant 2.000000e+00 : f32
    %45 = vector.broadcast %cst_20 : f32 to vector<1x16xf32>
    %46 = arith.subf %45, %44 : vector<1x16xf32>
    %47 = arith.mulf %43, %46 : vector<1x16xf32>
    %48 = vector.broadcast %47 : vector<1x16xf32> to vector<8x16xf32>
    %49 = arith.mulf %40, %48 : vector<8x16xf32>
    %50 = math.exp %49 : vector<8x16xf32>
    %51 = arith.mulf %50, %1 : vector<8x16xf32>
    %cst_21 = arith.constant dense<0.000000e+00> : vector<8xf32>
    %52 = vector.multi_reduction <add>, %50, %cst_21 [1] : vector<8x16xf32> to vector<8xf32>
    %53 = vector.shape_cast %52 : vector<8xf32> to vector<8x1xf32>
    %cst_22 = arith.constant dense<0.000000e+00> : vector<8xf32>
    %54 = vector.multi_reduction <add>, %51, %cst_22 [1] : vector<8x16xf32> to vector<8xf32>
    %55 = vector.shape_cast %54 : vector<8xf32> to vector<8x1xf32>
    %56 = arith.mulf %51, %1 : vector<8x16xf32>
    %cst_23 = arith.constant dense<0.000000e+00> : vector<8xf32>
    %57 = vector.multi_reduction <add>, %56, %cst_23 [1] : vector<8x16xf32> to vector<8xf32>
    %58 = vector.shape_cast %57 : vector<8xf32> to vector<8x1xf32>
    %59 = tpu.reciprocal %53 {approx = true} : vector<8x1xf32> -> vector<8x1xf32>
    %60 = arith.mulf %53, %59 : vector<8x1xf32>
    %cst_24 = arith.constant 2.000000e+00 : f32
    %61 = vector.broadcast %cst_24 : f32 to vector<8x1xf32>
    %62 = arith.subf %61, %60 : vector<8x1xf32>
    %63 = arith.mulf %59, %62 : vector<8x1xf32>
    %64 = arith.mulf %55, %63 : vector<8x1xf32>
    %65 = arith.mulf %58, %63 : vector<8x1xf32>
    %66 = arith.mulf %64, %64 : vector<8x1xf32>
    %67 = arith.subf %65, %66 : vector<8x1xf32>
    %cst_25 = arith.constant 9.99999997E-7 : f32
    %68 = vector.broadcast %cst_25 : f32 to vector<8x1xf32>
    %69 = arith.maximumf %67, %68 : vector<8x1xf32>
    %70 = math.sqrt %69 : vector<8x1xf32>
    %71 = tpu.concatenate %64, %70 in 0 : vector<8x1xf32>, vector<8x1xf32> -> vector<16x1xf32>
    %72 = tpu.transpose %71, [1, 0] : vector<16x1xf32> -> vector<1x16xf32>
    %73 = vector.shape_cast %72 : vector<1x16xf32> to vector<1x1x16xf32>
    %c0_26 = arith.constant 0 : index
    %c0_27 = arith.constant 0 : index
    %c0_28 = arith.constant 0 : index
    %74 = vector.load %arg7[%c0_26, %c0_27, %c0_28] : memref<1x1x16xf32, #tpu.memory_space<vmem>>, vector<1x1x16xf32>
    tpu.vector_store %arg7[%c0_26, %c0_27, %c0_28], %73 {strides = array<i32>} : memref<1x1x16xf32, #tpu.memory_space<vmem>>, vector<1x1x16xf32>,
    return
  }
  func.func @transform_0(%arg0: i32) -> (i32, i32, i32) {
    %c0_i32 = arith.constant 0 : i32
    %c0_i32_0 = arith.constant 0 : i32
    %c0_i32_1 = arith.constant 0 : i32
    return %arg0, %c0_i32, %c0_i32_0 : i32, i32, i32
  }
  func.func @transform_1(%arg0: i32) -> (i32, i32) {
    %c0_i32 = arith.constant 0 : i32
    %c0_i32_0 = arith.constant 0 : i32
    %c0_i32_1 = arith.constant 0 : i32
    return %c0_i32, %c0_i32_0 : i32, i32
  }
  func.func @transform_2(%arg0: i32) -> (i32, i32) {
    %c0_i32 = arith.constant 0 : i32
    %c0_i32_0 = arith.constant 0 : i32
    %c0_i32_1 = arith.constant 0 : i32
    return %c0_i32, %c0_i32_0 : i32, i32
  }
  func.func @transform_3(%arg0: i32) -> (i32, i32) {
    %c0_i32 = arith.constant 0 : i32
    %c0_i32_0 = arith.constant 0 : i32
    %c0_i32_1 = arith.constant 0 : i32
    return %c0_i32, %c0_i32_0 : i32, i32
  }
  func.func @transform_4(%arg0: i32) -> (i32, i32) {
    %c0_i32 = arith.constant 0 : i32
    %c0_i32_0 = arith.constant 0 : i32
    %c0_i32_1 = arith.constant 0 : i32
    return %c0_i32, %c0_i32_0 : i32, i32
  }
  func.func @transform_5(%arg0: i32) -> (i32, i32) {
    %c0_i32 = arith.constant 0 : i32
    %c0_i32_0 = arith.constant 0 : i32
    %c0_i32_1 = arith.constant 0 : i32
    return %c0_i32, %c0_i32_0 : i32, i32
  }
  func.func @transform_6(%arg0: i32) -> (i32, i32, i32) {
    %c0_i32 = arith.constant 0 : i32
    %c0_i32_0 = arith.constant 0 : i32
    %c0_i32_1 = arith.constant 0 : i32
    return %arg0, %c0_i32, %c0_i32_0 : i32, i32, i32
  }
}

</mosaic_0001>

<bundles_post_ra>
// kernel: tpu_custom_call.1
= control target key start
LH: loop header
LB: loop body
LE: loop exit
PB: predicated region body
PF: predicated region fallthrough
CT: control target
= control target key end

     0   :  { %11 = vsyncpa [#allocation3], 0  ;;  %s1050_s0 = inlined_call_operand.vmem [shape: f32[2,8,16], index: 0, kind: input, shape index: {}]   ;;  %s1051_s1 = inlined_call_operand.vmem [shape: f32[16,8], index: 1, kind: input, shape index: {}]   ;;  %s1052_s2 = inlined_call_operand.vmem [shape: f32[16,16], index: 2, kind: input, shape index: {}]   ;;  %s1053_s3 = inlined_call_operand.vmem [shape: f32[16,3], index: 3, kind: input, shape index: {}]   ;;  %s1054_s4 = inlined_call_operand.vmem [shape: f32[8,16], index: 4, kind: input, shape index: {}]   ;;  %s1055_s5 = inlined_call_operand.vmem [shape: f32[8,1], index: 5, kind: input, shape index: {}]   ;;  %s1056_s6 = inlined_call_operand.hbm [shape: f32[2,1,16], index: 6, kind: output, shape index: {}]  }
   0x1   :  { %13 = vsyncpa [#allocation3 + $0x1], 0  ;;  %s914_s21 = smov 0   ;;  %s916_s22 = smov 0  }
   0x2   :  { %s918_s23 = smov 0   ;;  %s920_s24 = smov 0  }
   0x3 LB: > { %s935_s25 = sadd.s32 4294967295, %s871_s24   ;;  %s703_s26 = sadd.s32 4294967294, %s871_s24   ;;  %s871_s24 = sphi %s920_s24, %s1062_s24   ;;  %s867_s23 = sphi %s918_s23, %s1061_s23   ;;  %s863_s22 = sphi %s916_s22, %s1060_s22   ;;  %s859_s21 = sphi %s914_s21, %s1059_s21  }
   0x4   : > { %s939_s27 = sadd.s32 1, %s871_s24   ;;  %s157_s28 = sadd.s32 1, %s867_s23 }
   0x5   : > { %s154_s29 = ssub.s32 %s871_s24, %s939_s27  ;;  %p167_p0 = scmp.ne.s32.totalorder %s867_s23, %s863_s22 }
   0x6   : > { %p155_p1 = scmp.eq.s32.totalorder %s154_s29, 0  ;;  %p168_p2 = scmp.eq.s32.totalorder %s935_s25, 1 }
   0x7   : > { %p173_p3 = scmp.ne.s32.totalorder %s863_s22, %s859_s21  ;;  %p174_p4 = scmp.eq.s32.totalorder %s703_s26, 1 }
   0x8   : > { %s950_s30 = scalar_select %p155_p1, %s867_s23, %s157_s28  }
   0x9   : > { %p952_p5 = por %p168_p2, %p167_p0  ;;  %p956_p6 = por %p174_p4, %p173_p3 }
   0xa   : > { %p706_p7 = scmp.ge.s32.totalorder %s871_s24, 1  ;;  %p214_p8 = scmp.lt.s32.totalorder %s871_s24, 3 }
   0xc   : > { %p215_p9 = pnand %p706_p7, %p214_p8 }
   0xd   : > { %p242_p10 = scmp.lt.s32.totalorder (!%p215_p9), %s935_s25, 1  ;;  %s240_s15 = sand.u32 (!%p215_p9), 1, %s863_s22  }
   0xe   : > { %218 = sbr.rel (%p215_p9) target bundleno = 1138 (0x472), region = 44  ;;  %s713_s16 = sshll.u32 (!%p215_p9), %s935_s25, 4 }
   0xf   : > { %s241_s17 = scalar_lea.vmem (!%p215_p9), [#allocation2], %s240_s15  ;;  %s1015_s26 = scalar_lea.hbm (!%p215_p9), %s1056_s6, %s713_s16 }
  0x10   : > { %s648_s18 = sshll.u32 (!%p215_p9), %s241_s17, 4  ;;  %s636_s28 = scalar_lea.sflag (!%p215_p9), [#allocation3], %s240_s15  ;;  %s649_s18 = int_to_ptr.vmem [resolvable:$true] %s648_s18 }
  0x11   : > { %s811_s29 = scalar_lea.vmem (!%p215_p9), %s649_s18, 16 }
  0x12   : > { %p812_p11 = scmp.ne.s32.totalorder (!%p215_p9), %s649_s18, %s811_s29 }
  0x13   : > { %s243_s9 = scalar_select %p242_p10, %s935_s25, 1  ;;  %vm247_vm0 = vcmask 130048   ;;  %v267_v4 = vld [vmem:[%s1052_s2] sm:$0xff]  ;;  %vm362_vm1 = vcmask 64512   ;;  %v351_v6 = vld [vmem:[%s1051_s1 + $0x8] sm:$0xff]  ;;  %v873_v8 = vmov 1  }
  0x14   : > { %730 = vmatprep.mubr.msk.f32.mxu0 %vm247_vm0, %v267_v4  ;;  %v350_v5 = vld [vmem:[%s1051_s1] sm:$0xff]  ;;  %790 = vset.pattern.permute.xlu1 %v873_v8  ;;  %v266_v9 = vld [vmem:[%s1053_s3 + $0x8] sm:$0xff]  ;;  %v874_v21 = vmov 0   ;;  %v875_v26 = vmov 2   ;;  %v876_v27 = vmov 0.0   ;;  %vm877_vm4 = vmmov 0   ;;  %p813_p12 = pnand %p812_p11, %p952_p5 }
  0x15   : > { %s707_s10 = sshll.u32 %s243_s9, 3  ;;  %v265_v7 = vld [vmem:[%s1053_s3] sm:$0xff]  ;;  %735 = vmatprep.mubr.msk.f32.mxu1 %vm362_vm1, %v350_v5  ;;  %789 = vset.pattern.permute.xlu0 %v873_v8  ;;  %v268_v20 = vld [vmem:[%s1052_s2 + $0x8] sm:$0xff]  ;;  %vm633_vm7 = vcmask 122880   ;;  %s878_s9 = smov [#allocation2]  }
  0x16   : > { %s245_s13 = scalar_lea.vmem %s1050_s0, %s707_s10  ;;  %448 = vperm.xlu1 %790, %v265_v7   ;;  %v471_v28 = vld [vmem:[%s1055_s5] sm:$0xff]  ;;  %p814_p13 = pneg %p813_p12 }
  0x17   : > { %v967_v0 = vld [vmem:[%s245_s13] sm:$0xff]  ;;  %s815_s10 = sshll.u32 %s878_s9, 4  ;;  %s816_s10 = int_to_ptr.vmem [resolvable:$false] %s815_s10 }
  0x18   : > { %v248_v1 = vsel %vm247_vm0, %v967_v0, 0.0  ;;  %v251_v2 = vmul.f32 %v967_v0, %v967_v0  ;;  %733 = vmatprep.subr.mxu1 %v967_v0  ;;  %v470_v46 = vld [vmem:[%s1054_s4] sm:$0xff]  ;;  %s817_s25 = scalar_lea.vmem %s816_s10, 32  ;;  %p818_p0 = scmp.lt.s32.totalorder %s649_s18, %s816_s10 }
  0x19   : > { %249 = vadd.xlane.f32.xlu0 %v248_v1  ;;  %734 = vmatpush3.msra.mxu1 %v967_v0  ;;  %p819_p1 = scmp.lt.s32.totalorder %s817_s25, %s811_s29 }
  0x1a   : > { %v252_v3 = vsel %vm247_vm0, %v251_v2, 0.0  ;;  %736 = vmatmul.mubr.msk.f32.vlgmr.msra.gmra.mxu1 %vm362_vm1, %v351_v6  ;;  %791 = vset.pattern.permute.xlu1 %v874_v21 }
  0x1b   : > { %738 = vmatprep.subr.mxu1 %v876_v27  ;;  %742 = vmatprep.mubr.msk.f32.mxu1 %vm877_vm4, %v876_v27  ;;  %p820_p2 = por %p819_p1, %p818_p0 }
  0x1d   : > { %253 = vadd.xlane.f32.xlu0 %v252_v3  ;;  %p821_p3 = pnand %p820_p2, %p814_p13 }
  0x33   : > { %453 = vperm.xlu0 %789, %v266_v9  }
  0x37   : > { %794 = vset.pattern.permute.xlu0 %v874_v21 }
  0x91   : > { %v449_v29 = vpop.permute.xlu1 %448 }
  0xa2   : > { %v250_v10 = vpop.xlane.xlu0 %249 }
  0xa3   : > { %v255_v11 = vmul.f32 %v250_v10, %v250_v10 }
  0xa6   : > { %v254_v12 = vpop.xlane.xlu0 %253 }
  0xa7   : > { %v256_v13 = vsub.f32 %v254_v12, %v255_v11 }
  0xa9   : > { %v257_v14 = vmax.f32 %v256_v13, 1e-06 }
  0xab   : > { %795 = vrsqrt.f32 %v257_v14  ;;  %vm260_vm2 = vcmp.eq.f32.partialorder %v257_v14, inf  ;;  %v263_v17 = vand.u32 2147483648, %v257_v14  ;;  %vm262_vm3 = vcmp.eq.f32.partialorder %v257_v14, 0.0 }
  0xae   : > { %v454_v37 = vpop.permute.xlu0 %453 }
  0xb8   : > { %v796_v15 = vpop.eup %795 }
  0xb9   : > { %v259_v16 = vmul.f32 %v796_v15, %v257_v14 }
  0xbb   : > { %v261_v18 = vsel %vm260_vm2, %v257_v14, %v259_v16 }
  0xbc   : > { %v264_v19 = vsel %vm262_vm3, %v263_v17, %v261_v18 }
  0xbd   : > { %726 = vmatprep.subr.mxu0 %v264_v19 }
  0xbe   : > { %727 = vmatpush3.msra.mxu0 %v264_v19 }
  0xbf   : > { %728 = vmatprep.subr.mxu0 %v250_v10 }
  0xc0   : > { %729 = vmatpush3.msra.mxu0 %v250_v10 }
  0xc1   : > { %731 = vmatmul.mubr.msk.f32.vlgmr.msra.gmra.mxu0 %vm247_vm0, %v268_v20 }
  0xda   : > { %v737_v30 = vpop.f32.mrf.mxu1 }
  0xdc   : > { %v435_v33 = vpop.f32.mrf.mxu1 }
 0x181   : > { %v732_v22 = vpop.f32.mrf.mxu0 }
 0x182   : > { %v347_v23 = vadd.f32 %v732_v22, %v266_v9 }
 0x183   : > { %v341_v24 = vpop.f32.mrf.mxu0 }
 0x184   : > { %359 = vperm.xlu1 %791, %v347_v23   ;;  %v342_v25 = vadd.f32 %v341_v24, %v265_v7 }
 0x188   : > { %354 = vperm.xlu1 %791, %v342_v25  }
 0x18c   : > { %792 = vset.pattern.permute.xlu1 %v875_v26 }
 0x18d   : > { %463 = vperm.xlu1 %792, %v266_v9  }
 0x191   : > { %459 = vperm.xlu1 %792, %v265_v7  }
 0x195   : > { %793 = vset.pattern.permute.xlu1 %v874_v21 }
 0x196   : > { %474 = vperm.xlu1 %793, %v471_v28  }
 0x1ff   : > { %v360_v31 = vpop.permute.xlu1 %359 }
 0x200   : > { %v441_v32 = vadd.f32 %v737_v30, %v360_v31 }
 0x202   : > { %v445_v34 = vmax.f32 %v441_v32, 0.0 }
 0x203   : > { %v355_v35 = vpop.permute.xlu1 %354 }
 0x204   : > { %v436_v36 = vadd.f32 %v435_v33, %v355_v35  ;;  %v457_v39 = vmul.f32 %v454_v37, %v445_v34 }
 0x206   : > { %v444_v38 = vmax.f32 %v436_v36, 0.0 }
 0x208   : > { %v464_v40 = vpop.permute.xlu1 %463  ;;  %v456_v42 = vmul.f32 %v449_v29, %v444_v38 }
 0x209   : > { %v467_v41 = vadd.f32 %v464_v40, %v457_v39 }
 0x20b   : > { %797 = vtanh.f32 %v467_v41 }
 0x20c   : > { %v460_v43 = vpop.permute.xlu1 %459 }
 0x20d   : > { %v466_v44 = vadd.f32 %v460_v43, %v456_v42 }
 0x20f   : > { %799 = vtanh.f32 %v466_v44 }
 0x211   : > { %v475_v48 = vpop.permute.xlu1 %474 }
 0x218   : > { %v798_v45 = vpop.eup %797 }
 0x219   : > { %739 = vmatpush3.msra.mxu1 %v798_v45 }
 0x21a   : > { %740 = vmatprep.subr.mxu1 %v876_v27 }
 0x21c   : > { %v800_v47 = vpop.eup %799 }
 0x21d   : > { %741 = vmatpush3.msra.mxu1 %v800_v47 }
 0x21e   : > { %743 = vmatmul.mubr.msk.f32.vlgmr.msra.gmra.mxu1 %vm247_vm0, %v470_v46 }
 0x2de   : > { %v546_v49 = vpop.f32.mrf.mxu1 }
 0x2df   : > { %v547_v50 = vadd.f32 %v546_v49, %v475_v48 }
 0x2e0   : > { %v744_v51 = vpop.f32.mrf.mxu1 }
 0x2e1   : > { %v550_v52 = vsel %vm247_vm0, %v547_v50, -inf }
 0x2e2   : > { %v551_v53 = vrot.slane %v550_v52, 4 }
 0x2e4   : > { %v552_v54 = vmax.f32 %v550_v52, %v551_v53 }
 0x2e6   : > { %v553_v55 = vrot.slane %v552_v54, 2 }
 0x2e8   : > { %v554_v56 = vmax.f32 %v552_v54, %v553_v55 }
 0x2ea   : > { %v555_v57 = vrot.slane %v554_v56, 1 }
 0x2ec   : > { %v556_v58 = vmax.f32 %v554_v56, %v555_v57 }
 0x2ee   : > { %v557_v59 = vsub.f32 %v547_v50, %v556_v58 }
 0x2f0   : > { %v558_v60 = vmul.f32 1.442695, %v557_v59 }
 0x2f2   : > { %801 = vpow2.f32 %v558_v60 }
 0x2ff   : > { %v802_v61 = vpop.eup %801 }
 0x300   : > { %v560_v62 = vsel %vm247_vm0, %v802_v61, 0.0 }
 0x301   : > { %v561_v63 = vrot.slane %v560_v62, 4 }
 0x303   : > { %v562_v1 = vadd.f32 %v561_v63, %v560_v62 }
 0x305   : > { %v563_v2 = vrot.slane %v562_v1, 2 }
 0x307   : > { %v564_v3 = vadd.f32 %v563_v2, %v562_v1 }
 0x309   : > { %v565_v4 = vrot.slane %v564_v3, 1 }
 0x30b   : > { %v566_v5 = vadd.f32 %v565_v4, %v564_v3 }
 0x30d   : > { %803 = vrcp.f32 %v566_v5 }
 0x31a   : > { %v804_v6 = vpop.eup %803 }
 0x31b   : > { %v568_v7 = vmul.f32 %v804_v6, %v566_v5 }
 0x31d   : > { %v569_v8 = vsub.f32 2.0, %v568_v7 }
 0x31f   : > { %v570_v9 = vmul.f32 %v804_v6, %v569_v8 }
 0x321   : > { %v571_v10 = vmul.f32 %v802_v61, %v570_v9 }
 0x323   : > { %v572_v11 = vmul.f32 1.442695, %v571_v10 }
 0x325   : > { %805 = vpow2.f32 %v572_v11 }
 0x332   : > { %v806_v12 = vpop.eup %805 }
 0x333   : > { %v575_v13 = vsel %vm247_vm0, %v806_v12, 0.0  ;;  %v574_v14 = vmul.f32 %v806_v12, %v967_v0 }
 0x334   : > { %576 = vadd.xlane.f32.xlu1 %v575_v13 }
 0x335   : > { %v578_v15 = vsel %vm247_vm0, %v574_v14, 0.0  ;;  %v581_v16 = vmul.f32 %v574_v14, %v967_v0 }
 0x336   : > { %579 = vadd.xlane.f32.xlu0 %v578_v15 }
 0x337   : > { %v582_v17 = vsel %vm247_vm0, %v581_v16, 0.0 }
 0x338   : > { %583 = vadd.xlane.f32.xlu1 %v582_v17 }
 0x3bd   : > { %v577_v18 = vpop.xlane.xlu1 %576 }
 0x3be   : > { %807 = vrcp.f32 %v577_v18 }
 0x3bf   : > { %v580_v23 = vpop.xlane.xlu0 %579 }
 0x3c1   : > { %v584_v25 = vpop.xlane.xlu1 %583 }
 0x3cb   : > { %v808_v19 = vpop.eup %807 }
 0x3cc   : > { %v586_v20 = vmul.f32 %v808_v19, %v577_v18 }
 0x3ce   : > { %v587_v21 = vsub.f32 2.0, %v586_v20 }
 0x3d0   : > { %v588_v22 = vmul.f32 %v808_v19, %v587_v21 }
 0x3d2   : > { %v589_v24 = vmul.f32 %v588_v22, %v580_v23  ;;  %v590_v27 = vmul.f32 %v588_v22, %v584_v25 }
 0x3d4   : > { %v591_v26 = vmul.f32 %v589_v24, %v589_v24  ;;  %601 = vxpose.xlu1.b32.start [1/2] (short) (narrow) %v589_v24, 8 }
 0x3d6   : > { %v592_v28 = vsub.f32 %v590_v27, %v591_v26 }
 0x3d8   : > { %v593_v0 = vmax.f32 %v592_v28, 1e-06 }
 0x3da   : > { %809 = vrsqrt.f32 %v593_v0  ;;  %vm596_vm5 = vcmp.eq.f32.partialorder %v593_v0, inf  ;;  %v599_v31 = vand.u32 2147483648, %v593_v0  ;;  %vm598_vm6 = vcmp.eq.f32.partialorder %v593_v0, 0.0 }
 0x3e7   : > { %v810_v29 = vpop.eup %809 }
 0x3e8   : > { %v595_v30 = vmul.f32 %v810_v29, %v593_v0 }
 0x3ea   : > { %v597_v32 = vsel %vm596_vm5, %v593_v0, %v595_v30 }
 0x3eb   : > { %v600_v33 = vsel %vm598_vm6, %v599_v31, %v597_v32 }
 0x3ec   : > { %602 = vxpose.xlu1.b32.end [2/2] (short) (narrow) %v600_v33, 8 }
 0x464   : > { %v617_v34 = vpop.trf.xlu1 }
 0x465   : > { %634 = vst.msk [vmem:[%s241_s17] sm:$0x1] %vm633_vm7, %v617_v34 }
 0x466   : > { %824 = shalt.err (!%p821_p3)
}
 0x467   : > { %s825_s11 = scalar_lea.hbm %s1015_s26, 16  ;;  %s829_s14 = scalar_lea.hbm %s1056_s6, 32 }
 0x468   : > { %p826_p4 = scmp.ne.s32.totalorder %s1015_s26, %s825_s11  ;;  %p830_p9 = scmp.lt.s32.totalorder %s1015_s26, %s1056_s6 }
 0x469   : > { %p831_p10 = scmp.lt.s32.totalorder %s829_s14, %s825_s11 }
 0x46a   : > { %p827_p7 = pnand %p826_p4, %p952_p5 }
 0x46b   : > { %p832_p11 = por %p831_p10, %p830_p9 }
 0x46c   : > { %p828_p8 = pneg %p827_p7 }
 0x46e   : > { %p833_p12 = pnand %p832_p11, %p828_p8 }
 0x470   : > { %836 = shalt.err (!%p833_p12)
}
 0x471   : > { %745 = dma.vmem_to_hbm [thread:$0]  (%p952_p5), %s649_s18, 16, %s1015_s26, %s636_s28  }
 0x472 PF: > { %p751_p13 = scmp.ge.s32.totalorder %s871_s24, 2  ;;  %s660_s17 = sand.u32 1, %s859_s21  }
 0x473   : > { %s661_s19 = scalar_lea.sflag [#allocation3], %s660_s17 }
 0x474   : > { %p748_p0 = pnand %p751_p13, %p956_p6 }
 0x476   : > { %p749_p1 = pneg %p748_p0 }
 0x478   : > { %854 = dma.done.wait (%p749_p1), %s661_s19, 16  }
 0x479   : > { %856 = vsyncadd (%p749_p1), %s661_s19, 4294967280  ;;  %p16_p2 = scmp.ge.s32.totalorder %s939_s27, 4   ;;  %s1059_s21 = smov %s863_s22 }
 0x47a   : > { %s1060_s22 = smov %s867_s23  ;;  %s1061_s23 = smov %s950_s30 }
 0x47b   : > { %s1062_s24 = smov %s939_s27  ;;  %18 = sbr.rel (!%p16_p2) target bundleno = 3 (0x3), region = 79 }
 0x480   :  { %665 = vsyncpa [#allocation3], 1 }
 0x481   :  { %667 = vsyncpa [#allocation3 + $0x1], 1 }

</bundles_post_ra>
